<compile_context>
chip_gen: v7x
topology: tpu7x:2x2x1
jax: 0.10.0
libtpu: 0.0.40
codegen_flags: <defaults>
</compile_context>

<pallas_src>
import functools

import jax
import jax.numpy as jnp
from jax.experimental import pallas as pl
from jax.experimental.pallas import tpu as pltpu


_LANE = 128     # lane quantum (last dim)
_SUBLANE = 8    # f32 sublane quantum (second-to-last dim)


def _round_up(n, m):
    return ((n + m - 1) // m) * m


# ----------------------------- Pallas kernel --------------------------------

def _fused_head_kernel(*refs, n_tail_layers: int):
    """refs = (x, w0, b0, [w_i, b_i] * n_tail_layers, o, acc).

    Grid = (batch tiles, K tiles of the first Linear).  The first Linear is
    accumulated over K into a VMEM f32 scratch; on the last K step the bias is
    added and the remaining (small, VMEM-resident) Linears + sigmoid are
    chained before a single lane-dense store.
    """
    x_ref, w0_ref, b0_ref = refs[0], refs[1], refs[2]
    o_ref, acc_ref = refs[-2], refs[-1]
    k = pl.program_id(1)

    @pl.when(k == 0)
    def _():
        acc_ref[...] = jnp.zeros_like(acc_ref)

    # First-layer K-tile: bf16 MXU operands, f32 accumulation.
    acc_ref[...] += jnp.dot(
        x_ref[...].astype(jnp.bfloat16),
        w0_ref[...],
        preferred_element_type=jnp.float32,
    )

    @pl.when(k == pl.num_programs(1) - 1)
    def _():
        h = acc_ref[...] + b0_ref[...]                      # f32 bias add
        for layer in range(n_tail_layers):
            w_ref = refs[3 + 2 * layer]
            b_ref = refs[4 + 2 * layer]
            h = jnp.dot(h.astype(jnp.bfloat16), w_ref[...],
                        preferred_element_type=jnp.float32) + b_ref[...]
        # Dropout(p) is identity at inference; sigmoid in f32 on the EUP.
        o_ref[...] = jax.nn.sigmoid(h).astype(o_ref.dtype)


# --------------------------- pallas_call wrapper -----------------------------

def _vmem_limit_bytes(tb, tk, padded_params, out_pad):
    h0_pad = padded_params[0][0].shape[1]
    est = 2 * (tb * tk * 4 + tk * h0_pad * 2)            # double-buffered x + W0 tiles
    est += 2 * h0_pad * 4                                # b0 (f32)
    for w_p, b_p in padded_params[1:]:
        est += 2 * (w_p.size * 2 + b_p.size * 4)         # resident tail (bf16 W, f32 b)
    est += 2 * tb * out_pad * 4                          # output buffers
    est += tb * h0_pad * 4                               # f32 accumulator scratch
    # Generous headroom for layout padding / internal scratch; stay <= 32 MiB
    # so it is safe on v7x (64 MiB physical VMEM per TensorCore).
    return int(min(max(4 * est, 16 * 1024 * 1024), 32 * 1024 * 1024))


def fused_label_cls_head(x_pad, padded_params, *, tb, tk):
    """x_pad: (B_pad, din_pad) f32; padded_params: [(W_bf16, b_f32), ...]."""
    b_pad_rows, din_pad = x_pad.shape
    assert b_pad_rows % tb == 0 and din_pad % tk == 0
    n_b, n_k = b_pad_rows // tb, din_pad // tk
    n_tail = len(padded_params) - 1
    out_pad = padded_params[-1][0].shape[1]
    h0_pad = padded_params[0][0].shape[1]

    w0_p, b0_p = padded_params[0]
    inputs = [x_pad, w0_p, b0_p]
    in_specs = [
        pl.BlockSpec((tb, tk), lambda b, k: (b, k)),         # x      (K-tiled)
        pl.BlockSpec((tk, h0_pad), lambda b, k: (k, 0)),     # W0     (K-tiled, bf16)
        pl.BlockSpec((1, h0_pad), lambda b, k: (0, 0)),      # b0     (resident)
    ]
    for (w_p, b_p) in padded_params[1:]:                     # small tail layers,
        inputs.extend([w_p, b_p])                            # whole-array resident
        in_specs.append(pl.BlockSpec(w_p.shape, lambda b, k: (0, 0)))
        in_specs.append(pl.BlockSpec((1, w_p.shape[1]), lambda b, k: (0, 0)))

    flops = 2 * b_pad_rows * sum(w.shape[0] * w.shape[1] for w, _ in padded_params)
    bytes_accessed = (
        x_pad.size * x_pad.dtype.itemsize
        + sum(w.size * w.dtype.itemsize + b.size * b.dtype.itemsize
              for w, b in padded_params)
        + b_pad_rows * out_pad * 4
    )
    cost = pl.CostEstimate(flops=flops,
                           transcendentals=b_pad_rows * out_pad,
                           bytes_accessed=bytes_accessed)

    kernel = functools.partial(_fused_head_kernel, n_tail_layers=n_tail)
    return pl.pallas_call(
        kernel,
        out_shape=jax.ShapeDtypeStruct((b_pad_rows, out_pad), jnp.float32),
        grid_spec=pltpu.PrefetchScalarGridSpec(
            num_scalar_prefetch=0,
            grid=(n_b, n_k),
            in_specs=in_specs,
            out_specs=pl.BlockSpec((tb, out_pad), lambda b, k: (b, 0)),
            scratch_shapes=[pltpu.VMEM((tb, h0_pad), jnp.float32)],
        ),
        compiler_params=pltpu.CompilerParams(
            dimension_semantics=("parallel", "arbitrary"),
            vmem_limit_bytes=_vmem_limit_bytes(tb, tk, padded_params, out_pad),
        ),
        cost_estimate=cost,
    )(*inputs)


# ----------------------------- Parameter setup ------------------------------

def trunc_normal(key, shape, std=0.02, dtype=jnp.float32):
    # matches nn.init.trunc_normal_(mean=0, std=0.02)
    return std * jax.random.truncated_normal(key, -2.0, 2.0, shape, dtype)


def init_label_cls_head_params(key, d_feature, d_hidden, n_labels):
    """Returns list of f32 (W_t, b) with W_t already transposed to (in, out)."""
    dims_in = [d_feature] + list(d_hidden)
    dims_out = list(d_hidden) + [n_labels]
    params = []
    for din, dout in zip(dims_in, dims_out):
        key, wk = jax.random.split(key)
        w = trunc_normal(wk, (dout, din))          # PyTorch Linear weight layout
        b = jnp.zeros((dout,), jnp.float32)        # constant 0 init
        params.append((w.T, b))                    # transpose once, outside kernel
    return params


def prepare_padded_params(params):
    """Zero-pad every (in, out) weight/bias to lane multiples of 128.

    Weights are cast to bf16 (halves HBM->VMEM DMA bytes; bf16-native MXU on
    v5e/v6e/v7x); biases stay f32 so the bias add + sigmoid run in f32.
    Padded columns give exactly-zero contributions, so the real output block
    matches the unpadded math.
    """
    padded = []
    for (w_t, b) in params:
        din, dout = w_t.shape
        din_p = _round_up(din, _LANE)
        dout_p = _round_up(dout, _LANE)
        w_p = jnp.zeros((din_p, dout_p), jnp.bfloat16)
        w_p = w_p.at[:din, :dout].set(w_t.astype(jnp.bfloat16))
        b_p = jnp.zeros((1, dout_p), jnp.float32).at[0, :dout].set(b)
        padded.append((w_p, b_p))
    return padded


# ----------------------------- Forward wrapper ------------------------------

def _batch_tiling(batch):
    """(B_pad, tb): single full-extent tile for small batches (no padding,
    exempt from the 8-row rule); 128-row tiles for large batches so the
    'parallel' batch axis has >= 2 tiles to shard across v7x TensorCores."""
    if batch <= 128:
        return batch, batch
    return _round_up(batch, 128), 128


def _pick_k_tile(din_pad, tk=None):
    if tk is not None:
        assert din_pad % tk == 0 and tk % _LANE == 0
        return tk
    for cand in (512, 256, 128):
        if din_pad % cand == 0:
            return cand
    return din_pad


def label_cls_head_forward(emb, padded_params, d_feature, n_labels, *, tk=None):
    """emb: (batch, emb_len, d_model) -> y_pred: (batch, n_labels)."""
    batch = emb.shape[0]
    x = emb.reshape(batch, -1)                      # nn.Flatten(start_dim=1)
    assert x.shape[1] == d_feature
    din_pad = padded_params[0][0].shape[0]
    if din_pad != d_feature:                        # no-op at lane-aligned d_feature
        x = jnp.pad(x, ((0, 0), (0, din_pad - d_feature)))
    b_pad, tb = _batch_tiling(batch)
    if b_pad != batch:
        x = jnp.pad(x, ((0, b_pad - batch), (0, 0)))
    tk_sel = _pick_k_tile(din_pad, tk)
    y_pad = fused_label_cls_head(x, padded_params, tb=tb, tk=tk_sel)
    # Padded label lanes hold sigmoid(0) = 0.5 -> always slice the real block.
    return y_pad[:batch, :n_labels]


# ---------------------------------- Main ------------------------------------

if __name__ == "__main__":
    # Small, module-consistent shapes.
    batch_size, emb_len, d_model = 2, 8, 32
    d_feature = emb_len * d_model                  # 256
    d_hidden = [128, 64]
    n_labels = 6

    key = jax.random.PRNGKey(0)
    key, emb_key = jax.random.split(key)
    emb = jax.random.normal(emb_key, (batch_size, emb_len, d_model), jnp.float32)

    params = init_label_cls_head_params(key, d_feature, d_hidden, n_labels)
    padded_params = prepare_padded_params(params)

    # tk=128 -> 2 K-steps so the accumulator / pipelining path is exercised.
    fwd = jax.jit(functools.partial(
        label_cls_head_forward, padded_params=padded_params,
        d_feature=d_feature, n_labels=n_labels, tk=128))
    y_pred = jax.block_until_ready(fwd(emb))

    # bf16-consistent pure-JAX reference (same mixed precision as the kernel).
    x_flat = emb.reshape(batch_size, -1)
    h = x_flat
    for (w_t, b) in params:
        h = jnp.dot(h.astype(jnp.bfloat16), w_t.astype(jnp.bfloat16),
                    preferred_element_type=jnp.float32) + b
    y_ref_bf16 = jax.nn.sigmoid(h)

    # Full-f32 reference (coarse sanity check of the bf16 rounding error).
    hf = x_flat
    for (w_t, b) in params:
        hf = hf @ w_t + b
    y_ref_f32 = jax.nn.sigmoid(hf)

    assert y_pred.shape == (batch_size, n_labels)
    assert jnp.allclose(y_pred, y_ref_bf16, atol=1e-4, rtol=1e-4), (
        "mismatch vs bf16-consistent reference")
    assert jnp.allclose(y_pred, y_ref_f32, atol=2e-2), (
        "mismatch vs f32 reference beyond bf16 rounding budget")
    print("KERNEL_OK")
</pallas_src>

<mosaic_0001>
module attributes {stable_mosaic.version = 11 : i64} {
  func.func @_fused_head_kernel(%arg0: i32, %arg1: i32, %arg2: memref<2x128xf32, #tpu.memory_space<vmem>>, %arg3: memref<128x128xbf16, #tpu.memory_space<vmem>>, %arg4: memref<1x128xf32, #tpu.memory_space<vmem>>, %arg5: memref<128x128xbf16, #tpu.memory_space<vmem>>, %arg6: memref<1x128xf32, #tpu.memory_space<vmem>>, %arg7: memref<128x128xbf16, #tpu.memory_space<vmem>>, %arg8: memref<1x128xf32, #tpu.memory_space<vmem>>, %arg9: memref<2x128xf32, #tpu.memory_space<vmem>>, %arg10: memref<2x128xf32, #tpu.memory_space<vmem>>) attributes {dimension_semantics = [#tpu.dimension_semantics<parallel>, #tpu.dimension_semantics<arbitrary>], iteration_bounds = array<i64: 1, 2>, scalar_prefetch = 0 : i64, scratch_operands = 1 : i64, tpu.core_type = #tpu.core_type<tc>, window_params = [{transform_indices = @transform_0, window_bounds = array<i64: 2, 128>}, {transform_indices = @transform_1, window_bounds = array<i64: 128, 128>}, {pipeline_mode = #tpu.pipeline_mode<synchronous>, transform_indices = @transform_2, window_bounds = array<i64: 1, 128>}, {pipeline_mode = #tpu.pipeline_mode<synchronous>, transform_indices = @transform_3, window_bounds = array<i64: 128, 128>}, {pipeline_mode = #tpu.pipeline_mode<synchronous>, transform_indices = @transform_4, window_bounds = array<i64: 1, 128>}, {pipeline_mode = #tpu.pipeline_mode<synchronous>, transform_indices = @transform_5, window_bounds = array<i64: 128, 128>}, {pipeline_mode = #tpu.pipeline_mode<synchronous>, transform_indices = @transform_6, window_bounds = array<i64: 1, 128>}, {transform_indices = @transform_7, window_bounds = array<i64: 2, 128>}]} {
    %c0_i32 = arith.constant 0 : i32
    %0 = arith.cmpi eq, %arg1, %c0_i32 : i32
    %1 = arith.extui %0 : i1 to i32
    %c0_i32_0 = arith.constant 0 : i32
    %2 = arith.cmpi ne, %1, %c0_i32_0 : i32
    scf.if %2 {
      %cst_9 = arith.constant 0.000000e+00 : f32
      %13 = vector.broadcast %cst_9 : f32 to vector<2x128xf32>
      %c0_10 = arith.constant 0 : index
      %c0_11 = arith.constant 0 : index
      %14 = vector.load %arg10[%c0_10, %c0_11] : memref<2x128xf32, #tpu.memory_space<vmem>>, vector<2x128xf32>
      tpu.vector_store %arg10[%c0_10, %c0_11], %13 {strides = array<i32>} : memref<2x128xf32, #tpu.memory_space<vmem>>, vector<2x128xf32>,
    } else {
    }
    %c0 = arith.constant 0 : index
    %c0_1 = arith.constant 0 : index
    %3 = vector.load %arg10[%c0, %c0_1] : memref<2x128xf32, #tpu.memory_space<vmem>>, vector<2x128xf32>
    %c0_2 = arith.constant 0 : index
    %c0_3 = arith.constant 0 : index
    %4 = vector.load %arg2[%c0_2, %c0_3] : memref<2x128xf32, #tpu.memory_space<vmem>>, vector<2x128xf32>
    %5 = arith.truncf %4 : vector<2x128xf32> to vector<2x128xbf16>
    %c0_4 = arith.constant 0 : index
    %c0_5 = arith.constant 0 : index
    %6 = vector.load %arg3[%c0_4, %c0_5] : memref<128x128xbf16, #tpu.memory_space<vmem>>, vector<128x128xbf16>
    %cst = arith.constant dense<0.000000e+00> : vector<2x128xf32>
    %7 = tpu.matmul %5, %6, %cst {dimension_numbers = #tpu.dot_dimension_numbers<[1], [0], [0], [1], [0, 0, 1, 1], [], []>} : vector<2x128xbf16>, vector<128x128xbf16>, vector<2x128xf32> -> vector<2x128xf32>
    %8 = arith.addf %3, %7 : vector<2x128xf32>
    %c0_6 = arith.constant 0 : index
    %c0_7 = arith.constant 0 : index
    %9 = vector.load %arg10[%c0_6, %c0_7] : memref<2x128xf32, #tpu.memory_space<vmem>>, vector<2x128xf32>
    tpu.vector_store %arg10[%c0_6, %c0_7], %8 {strides = array<i32>} : memref<2x128xf32, #tpu.memory_space<vmem>>, vector<2x128xf32>,
    %c1_i32 = arith.constant 1 : i32
    %10 = arith.cmpi eq, %arg1, %c1_i32 : i32
    %11 = arith.extui %10 : i1 to i32
    %c0_i32_8 = arith.constant 0 : i32
    %12 = arith.cmpi ne, %11, %c0_i32_8 : i32
    scf.if %12 {
      %c0_9 = arith.constant 0 : index
      %c0_10 = arith.constant 0 : index
      %13 = vector.load %arg10[%c0_9, %c0_10] : memref<2x128xf32, #tpu.memory_space<vmem>>, vector<2x128xf32>
      %c0_11 = arith.constant 0 : index
      %c0_12 = arith.constant 0 : index
      %14 = vector.load %arg4[%c0_11, %c0_12] : memref<1x128xf32, #tpu.memory_space<vmem>>, vector<1x128xf32>
      %15 = vector.broadcast %14 : vector<1x128xf32> to vector<2x128xf32>
      %16 = arith.addf %13, %15 : vector<2x128xf32>
      %17 = arith.truncf %16 : vector<2x128xf32> to vector<2x128xbf16>
      %c0_13 = arith.constant 0 : index
      %c0_14 = arith.constant 0 : index
      %18 = vector.load %arg5[%c0_13, %c0_14] : memref<128x128xbf16, #tpu.memory_space<vmem>>, vector<128x128xbf16>
      %cst_15 = arith.constant dense<0.000000e+00> : vector<2x128xf32>
      %19 = tpu.matmul %17, %18, %cst_15 {dimension_numbers = #tpu.dot_dimension_numbers<[1], [0], [0], [1], [0, 0, 1, 1], [], []>} : vector<2x128xbf16>, vector<128x128xbf16>, vector<2x128xf32> -> vector<2x128xf32>
      %c0_16 = arith.constant 0 : index
      %c0_17 = arith.constant 0 : index
      %20 = vector.load %arg6[%c0_16, %c0_17] : memref<1x128xf32, #tpu.memory_space<vmem>>, vector<1x128xf32>
      %21 = vector.broadcast %20 : vector<1x128xf32> to vector<2x128xf32>
      %22 = arith.addf %19, %21 : vector<2x128xf32>
      %23 = arith.truncf %22 : vector<2x128xf32> to vector<2x128xbf16>
      %c0_18 = arith.constant 0 : index
      %c0_19 = arith.constant 0 : index
      %24 = vector.load %arg7[%c0_18, %c0_19] : memref<128x128xbf16, #tpu.memory_space<vmem>>, vector<128x128xbf16>
      %cst_20 = arith.constant dense<0.000000e+00> : vector<2x128xf32>
      %25 = tpu.matmul %23, %24, %cst_20 {dimension_numbers = #tpu.dot_dimension_numbers<[1], [0], [0], [1], [0, 0, 1, 1], [], []>} : vector<2x128xbf16>, vector<128x128xbf16>, vector<2x128xf32> -> vector<2x128xf32>
      %c0_21 = arith.constant 0 : index
      %c0_22 = arith.constant 0 : index
      %26 = vector.load %arg8[%c0_21, %c0_22] : memref<1x128xf32, #tpu.memory_space<vmem>>, vector<1x128xf32>
      %27 = vector.broadcast %26 : vector<1x128xf32> to vector<2x128xf32>
      %28 = arith.addf %25, %27 : vector<2x128xf32>
      %29 = arith.negf %28 : vector<2x128xf32>
      %30 = math.exp %29 : vector<2x128xf32>
      %cst_23 = arith.constant 1.000000e+00 : f32
      %31 = vector.broadcast %cst_23 : f32 to vector<2x128xf32>
      %32 = arith.addf %31, %30 : vector<2x128xf32>
      %33 = arith.divf %31, %32 : vector<2x128xf32>
      %c0_24 = arith.constant 0 : index
      %c0_25 = arith.constant 0 : index
      %34 = vector.load %arg9[%c0_24, %c0_25] : memref<2x128xf32, #tpu.memory_space<vmem>>, vector<2x128xf32>
      tpu.vector_store %arg9[%c0_24, %c0_25], %33 {strides = array<i32>} : memref<2x128xf32, #tpu.memory_space<vmem>>, vector<2x128xf32>,
    } else {
    }
    return
  }
  func.func @transform_0(%arg0: i32, %arg1: i32) -> (i32, i32) {
    %c0_i32 = arith.constant 0 : i32
    return %arg0, %arg1 : i32, i32
  }
  func.func @transform_1(%arg0: i32, %arg1: i32) -> (i32, i32) {
    %c0_i32 = arith.constant 0 : i32
    %c0_i32_0 = arith.constant 0 : i32
    return %arg1, %c0_i32 : i32, i32
  }
  func.func @transform_2(%arg0: i32, %arg1: i32) -> (i32, i32) {
    %c0_i32 = arith.constant 0 : i32
    %c0_i32_0 = arith.constant 0 : i32
    %c0_i32_1 = arith.constant 0 : i32
    return %c0_i32, %c0_i32_0 : i32, i32
  }
  func.func @transform_3(%arg0: i32, %arg1: i32) -> (i32, i32) {
    %c0_i32 = arith.constant 0 : i32
    %c0_i32_0 = arith.constant 0 : i32
    %c0_i32_1 = arith.constant 0 : i32
    return %c0_i32, %c0_i32_0 : i32, i32
  }
  func.func @transform_4(%arg0: i32, %arg1: i32) -> (i32, i32) {
    %c0_i32 = arith.constant 0 : i32
    %c0_i32_0 = arith.constant 0 : i32
    %c0_i32_1 = arith.constant 0 : i32
    return %c0_i32, %c0_i32_0 : i32, i32
  }
  func.func @transform_5(%arg0: i32, %arg1: i32) -> (i32, i32) {
    %c0_i32 = arith.constant 0 : i32
    %c0_i32_0 = arith.constant 0 : i32
    %c0_i32_1 = arith.constant 0 : i32
    return %c0_i32, %c0_i32_0 : i32, i32
  }
  func.func @transform_6(%arg0: i32, %arg1: i32) -> (i32, i32) {
    %c0_i32 = arith.constant 0 : i32
    %c0_i32_0 = arith.constant 0 : i32
    %c0_i32_1 = arith.constant 0 : i32
    return %c0_i32, %c0_i32_0 : i32, i32
  }
  func.func @transform_7(%arg0: i32, %arg1: i32) -> (i32, i32) {
    %c0_i32 = arith.constant 0 : i32
    %c0_i32_0 = arith.constant 0 : i32
    return %arg0, %c0_i32 : i32, i32
  }
}

</mosaic_0001>

<bundles_post_ra>
// kernel: label_cls_head_forward.1
= control target key start
LH: loop header
LB: loop body
LE: loop exit
PB: predicated region body
PF: predicated region fallthrough
CT: control target
= control target key end

     0   :  { %12 = vsyncpa [#allocation4], 0  ;;  %s1561_s0 = inlined_call_operand.vmem [shape: f32[2,256], index: 0, kind: input, shape index: {}]   ;;  %s1562_s1 = inlined_call_operand.hbm [shape: bf16[256,128], index: 1, kind: input, shape index: {}]   ;;  %s1563_s2 = inlined_call_operand.vmem [shape: f32[1,128], index: 2, kind: input, shape index: {}, may-alias: {2,4,6}]   ;;  %s1564_s3 = inlined_call_operand.hbm [shape: bf16[128,128], index: 3, kind: input, shape index: {}]   ;;  %s1565_s4 = inlined_call_operand.vmem [shape: f32[1,128], index: 4, kind: input, shape index: {}, may-alias: {2,4,6}]   ;;  %s1566_s5 = inlined_call_operand.hbm [shape: bf16[128,128], index: 5, kind: input, shape index: {}]   ;;  %s1567_s6 = inlined_call_operand.vmem [shape: f32[1,128], index: 6, kind: input, shape index: {}, may-alias: {2,4,6}]   ;;  %s1568_s7 = inlined_call_operand.hbm [shape: f32[2,128], index: 7, kind: output, shape index: {}]  }
   0x1   :  { %14 = vsyncpa [#allocation4 + $0x1], 0 }
   0x2   :  { %15 = vsyncpa [#allocation7], 0 }
   0x3   :  { %16 = vsyncpa [#allocation5], 0  ;;  %s1305_s24 = smov 0   ;;  %s1307_s25 = smov 0  }
   0x4   :  { %s1309_s26 = smov 0   ;;  %s1311_s27 = smov 0  }
   0x5   :  { %s1313_s28 = smov 0   ;;  %s1315_s29 = smov 0  }
   0x6 LB: > { %s1573_s30 = sadd.s32 4294967295, %s1252_s29   ;;  %p82_p0 = scmp.ne.s32.totalorder %s1236_s25, %s1232_s24  ;;  %s1252_s29 = sphi %s1315_s29, %s22_s29   ;;  %s1248_s28 = sphi %s1313_s28, %s1588_s28   ;;  %s1244_s27 = sphi %s1311_s27, %s1587_s27   ;;  %s1240_s26 = sphi %s1309_s26, %s1586_s26   ;;  %s1236_s25 = sphi %s1307_s25, %s1585_s25   ;;  %s1232_s24 = sphi %s1305_s24, %s1584_s24  }
   0x7   : > { %p1337_p1 = scmp.eq.s32.totalorder %s1573_s30, 0  ;;  %p830_p2 = scmp.ge.s32.totalorder %s1252_s29, 1 }
   0x8   : > { %p224_p3 = scmp.lt.s32.totalorder %s1252_s29, 3  ;;  %s1254_s11 = smov [#allocation6]  }
   0x9   : > { %s1574_s8 = scalar_select %p1337_p1, 1, 0 }
   0xa   : > { %p1345_p4 = por %p1337_p1, %p82_p0  ;;  %p1349_p5 = pnand %p830_p2, %p224_p3 }
   0xb   : > { %s239_s12 = sshll.u32 %s1254_s11, 4  ;;  %s1255_s14 = smov [#allocation8]   ;;  %s240_s12 = int_to_ptr.vmem [resolvable:$true] %s239_s12 }
   0xc   : > { %s1575_s9 = scalar_select %p1345_p4, 1, 0 }
   0xd   : > { %s1576_s10 = scalar_select %p1349_p5, 1, 0 }
   0xe   : > { %p978_p6 = pneg %p1349_p5  ;;  %s255_s15 = sshll.u32 %s1255_s14, 4  ;;  %s1361_s15 = int_to_ptr.vmem [resolvable:$true] %s255_s15 }
   0xf   : > { %s1082_s18 = scalar_lea.hbm %s1564_s3, 1024 }
  0x10   : > { %p1357_p7 = pnand %p978_p6, %p1337_p1  ;;  %p1083_p8 = scmp.ne.s32.totalorder %s1564_s3, %s1082_s18 }
  0x11   : > { %p1089_p12 = scmp.lt.u32.totalorder %s1082_s18, %s1564_s3 }
  0x12   : > { %p1084_p9 = pneg %p1357_p7 }
  0x14   : > { %p1085_p10 = pnand %p1084_p9, %p1083_p8 }
  0x16   : > { %p1086_p11 = pneg %p1085_p10 }
  0x18   : > { %p1091_p13 = pnand %p1089_p12, %p1086_p11 }
  0x1a   : > { %1094 = shalt.err (!%p1091_p13)
}
  0x1b   : > { %s1095_s23 = scalar_lea.vmem %s240_s12, 1024  ;;  %p1103_p6 = scmp.lt.s32.totalorder %s240_s12, %s240_s12 }
  0x1c   : > { %p1096_p0 = scmp.ne.s32.totalorder %s240_s12, %s1095_s23  ;;  %p1104_p1 = scmp.lt.s32.totalorder %s1095_s23, %s1095_s23 }
  0x1e   : > { %p1098_p2 = pnand %p1096_p0, %p1084_p9  ;;  %p1105_p4 = por %p1104_p1, %p1103_p6 }
  0x20   : > { %p1099_p3 = pneg %p1098_p2 }
  0x22   : > { %p1106_p5 = pnand %p1105_p4, %p1099_p3 }
  0x24   : > { %1109 = shalt.err (!%p1106_p5)
}
  0x25   : > { %s1256_s24 = smov 64   ;;  %s1257_s11 = smov 4  }
  0x26   : > { %981 = dma.hbm_to_vmem [thread:$0]  (!%p1357_p7), %s1564_s3, 1024, %s240_s12, [#allocation7], %s1256_s24, %s1256_s24, %s1257_s11  }
  0x27   : > { %s1110_s19 = scalar_lea.hbm %s1566_s5, 1024 }
  0x28   : > { %p1111_p1 = scmp.ne.s32.totalorder %s1566_s5, %s1110_s19  ;;  %p1117_p8 = scmp.lt.u32.totalorder %s1110_s19, %s1566_s5 }
  0x2a   : > { %p1113_p4 = pnand %p1111_p1, %p1084_p9 }
  0x2c   : > { %p1114_p5 = pneg %p1113_p4 }
  0x2e   : > { %p1119_p10 = pnand %p1117_p8, %p1114_p5 }
  0x30   : > { %1122 = shalt.err (!%p1119_p10)
}
  0x31   : > { %s1123_s12 = scalar_lea.vmem %s1361_s15, 1024  ;;  %p1131_p0 = scmp.lt.s32.totalorder %s1361_s15, %s1361_s15 }
  0x32   : > { %p1124_p11 = scmp.ne.s32.totalorder %s1361_s15, %s1123_s12  ;;  %p1132_p2 = scmp.lt.s32.totalorder %s1123_s12, %s1123_s12 }
  0x34   : > { %p1126_p12 = pnand %p1124_p11, %p1084_p9  ;;  %p1133_p3 = por %p1132_p2, %p1131_p0 }
  0x36   : > { %p1127_p13 = pneg %p1126_p12 }
  0x38   : > { %p1134_p6 = pnand %p1133_p3, %p1127_p13 }
  0x3a   : > { %1137 = shalt.err (!%p1134_p6)
}
  0x3b   : > { %984 = dma.hbm_to_vmem [thread:$0]  (!%p1357_p7), %s1566_s5, 1024, %s1361_s15, [#allocation7], %s1256_s24, %s1256_s24, %s1257_s11  }
  0x3c   : > { %s31_s17 = sadd.s32 1, %s1248_s28  ;;  %s69_s13 = sadd.s32 1, %s1240_s26 }
  0x3d   : > { %p32_p9 = scmp.ge.s32.totalorder %s31_s17, 2  ;;  %p76_p1 = scmp.ne.s32.totalorder %s1240_s26, %s1236_s25 }
  0x3e   : > { %p77_p4 = scmp.eq.s32.totalorder %s1252_s29, 0  ;;  %p991_p5 = scmp.lt.s32.totalorder %s1252_s29, 2 }
  0x3f   : > { %s1590_s17 = smov (%p32_p9, %s31_s17), 0  ;;  %s283_s18 = sand.u32 1, %s1240_s26  }
  0x40   : > { %p78_p8 = por %p77_p4, %p76_p1  ;;  %s66_s19 = ssub.s32 %s1248_s28, %s1590_s17 }
  0x41   : > { %p67_p10 = scmp.eq.s32.totalorder %s66_s19, 0  ;;  %s834_s20 = sshll.u32 %s283_s18, 6 }
  0x42   : > { %s876_s21 = sshll.u32 %s1248_s28, 10  ;;  %s287_s14 = scalar_lea.vmem [#allocation3], %s834_s20 }
  0x43   : > { %s1429_s22 = scalar_select %p67_p10, %s1240_s26, %s69_s13  }
  0x44   : > { %s1434_s12 = scalar_lea.hbm %s1562_s1, %s876_s21  ;;  %s294_s16 = sshll.u32 %s287_s14, 4  ;;  %s1436_s16 = int_to_ptr.vmem [resolvable:$true] %s294_s16 }
  0x45   : > { %p1440_p7 = pnand %p991_p5, %p78_p8  ;;  %s1444_s13 = scalar_lea.sflag [#allocation4], %s283_s18 }
  0x46   : > { %s1138_s23 = scalar_lea.hbm %s1434_s12, 1024  ;;  %s1143_s15 = scalar_lea.hbm %s1562_s1, 2048 }
  0x47   : > { %p1139_p11 = scmp.ne.s32.totalorder %s1434_s12, %s1138_s23  ;;  %p1140_p12 = pneg %p1440_p7 }
  0x48   : > { %p1144_p2 = scmp.lt.u32.totalorder %s1434_s12, %s1562_s1  ;;  %p1145_p3 = scmp.lt.u32.totalorder %s1143_s15, %s1138_s23 }
  0x49   : > { %p1141_p13 = pnand %p1140_p12, %p1139_p11  ;;  %p1147_p9 = scmp.lt.u32.totalorder %s1138_s23, %s1434_s12 }
  0x4a   : > { %p1146_p6 = por %p1145_p3, %p1144_p2 }
  0x4b   : > { %p1142_p0 = pneg %p1141_p13 }
  0x4c   : > { %p1148_p1 = por %p1147_p9, %p1146_p6 }
  0x4e   : > { %p1149_p4 = pnand %p1148_p1, %p1142_p0 }
  0x50   : > { %1152 = shalt.err (!%p1149_p4)
}
  0x51   : > { %s1153_s18 = scalar_lea.vmem %s1436_s16, 1024  ;;  %s1258_s20 = smov [#allocation3]  }
  0x52   : > { %p1154_p5 = scmp.ne.s32.totalorder %s1436_s16, %s1153_s18  ;;  %s1158_s21 = sshll.u32 %s1258_s20, 4  ;;  %s1159_s21 = int_to_ptr.vmem [resolvable:$false] %s1158_s21 }
  0x53   : > { %s1160_s30 = scalar_lea.vmem %s1159_s21, 2048  ;;  %p1161_p11 = scmp.lt.s32.totalorder %s1436_s16, %s1159_s21 }
  0x54   : > { %p1156_p8 = pnand %p1154_p5, %p1140_p12  ;;  %p1162_p13 = scmp.lt.s32.totalorder %s1160_s30, %s1153_s18 }
  0x56   : > { %p1157_p10 = pneg %p1156_p8  ;;  %p1163_p2 = por %p1162_p13, %p1161_p11 }
  0x58   : > { %p1164_p3 = pnand %p1163_p2, %p1157_p10 }
  0x5a   : > { %1167 = shalt.err (!%p1164_p3)
}
  0x5b   : > { %988 = dma.hbm_to_vmem [thread:$0]  (!%p1440_p7), %s1434_s12, 1024, %s1436_s16, %s1444_s13, %s1256_s24, %s1256_s24, %s1257_s11  }
  0x5c   : > { %p1579_p12 = scmp.ne.s32.totalorder %s1576_s10, 0 }
  0x5d   : > { %s308_s23 = sand.u32 (!%p1579_p12), 1, %s1236_s25   ;;  %p1580_p0 = scmp.ne.s32.totalorder (!%p1579_p12), %s1575_s9, 0 }
  0x5e   : > { %306 = sbr.rel (%p1579_p12) target bundleno = 856 (0x358), region = 48  ;;  %s838_s15 = sshll.u32 (!%p1579_p12), %s308_s23, 6 }
  0x5f   : > { %s309_s14 = scalar_lea.sflag (!%p1579_p12), [#allocation4], %s308_s23  ;;  %s1478_s18 = scalar_lea.vmem (!%p1579_p12), [#allocation3], %s838_s15 }
  0x65   : > { %1219 = dma.done.wait (%p1580_p0), %s309_s14, 1024  }
  0x66   : > { %1221 = vsyncadd (%p1580_p0), %s309_s14, 4294966272  ;;  %p1581_p6 = scmp.ne.s32.totalorder %s1574_s8, 0 }
  0x68   : > { %1223 = dma.done.wait (%p1581_p6), [#allocation7], 2048  }
  0x69   : > { %1225 = vsyncadd (%p1581_p6), [#allocation7], 4294965248  ;;  %p356_p7 = scmp.lt.s32.totalorder %s1244_s27, 1  ;;  %p842_p9 = scmp.ne.s32.totalorder %s1244_s27, 0 }
  0x6a   : > { %v1259_v0 = vmov (!%p842_p9), 0.0  }
  0x6b   : > { %s357_s10 = scalar_select %p356_p7, %s1244_s27, 1 }
  0x6c   : > { %367 = sbr.rel (%p842_p9) target bundleno = 115 (0x73), region = 64  ;;  %368 = vst [vmem:[#allocation2] sm:$0x3] (!%p842_p9), %v1259_v0 }
  0x6d   : > { %s841_s24 = sshll.u32 %s357_s10, 1 }
  0x6e   : > { %s1493_s16 = scalar_lea.vmem %s1561_s0, %s841_s24 }
  0x73 PF: > { %v1054_v1 = vld [vmem:[%s1478_s18] sm:$0xff]   ;;  %v1260_v2 = vmov 0.0   ;;  %v1055_v3 = vld [vmem:[%s1478_s18 + $0x8] sm:$0xff]   ;;  %vm1261_vm0 = vmmov 0   ;;  %v1056_v4 = vld [vmem:[%s1478_s18 + $0x10] sm:$0xff]   ;;  %p851_p1 = scmp.ne.s32.totalorder %s1244_s27, 1 }
  0x74   : > { %904 = vmatprep.subr.bf16.mxu0 %v1260_v2  ;;  %920 = vmatprep.mubr.msk.bf16.mxu0 %vm1261_vm0, %v1260_v2  ;;  %v1057_v5 = vld [vmem:[%s1478_s18 + $0x18] sm:$0xff]   ;;  %v1058_v6 = vld [vmem:[%s1478_s18 + $0x20] sm:$0xff]   ;;  %v1059_v7 = vld [vmem:[%s1478_s18 + $0x28] sm:$0xff]   ;;  %v1262_v19 = vmov (!%p851_p1), 0.0   ;;  %vm1263_vm1 = vmmov (!%p851_p1), 0  }
  0x75   : > { %905 = vmatpush3.bf16.msra.mxu0 %v1054_v1  ;;  %v1060_v8 = vld [vmem:[%s1478_s18 + $0x30] sm:$0xff]   ;;  %v1061_v9 = vld [vmem:[%s1478_s18 + $0x38] sm:$0xff]   ;;  %v1062_v18 = vld [vmem:[#allocation6] sm:$0xff] (!%p851_p1)   ;;  %944 = vmatprep.subr.bf16.mxu1 (!%p851_p1), %v1262_v19 }
  0x76   : > { %906 = vmatprep.subr.bf16.mxu0 %v1260_v2  ;;  %v370_v10 = vld [vmem:[%s1493_s16] sm:$0x3]  ;;  %v1063_v20 = vld [vmem:[#allocation6 + $0x8] sm:$0xff] (!%p851_p1)   ;;  %960 = vmatprep.mubr.msk.bf16.mxu1 (!%p851_p1), %vm1263_vm1, %v1262_v19  ;;  %v1064_v21 = vld [vmem:[#allocation6 + $0x10] sm:$0xff] (!%p851_p1)  }
  0x77   : > { %v371_v11 = vpack.c.bf16 %v370_v10, %v370_v10  ;;  %v369_v12 = vld [vmem:[#allocation2] sm:$0x3]  ;;  %v1070_v22 = vld [vmem:[#allocation8] sm:$0xff] (!%p851_p1)   ;;  %v1071_v24 = vld [vmem:[#allocation8 + $0x8] sm:$0xff] (!%p851_p1)  }
  0x78   : > { %v1065_v23 = vld [vmem:[#allocation6 + $0x18] sm:$0xff] (!%p851_p1)   ;;  %945 = vmatpush3.bf16.msra.mxu1 (!%p851_p1), %v1070_v22  ;;  %v1066_v25 = vld [vmem:[#allocation6 + $0x20] sm:$0xff] (!%p851_p1)   ;;  %v1072_v26 = vld [vmem:[#allocation8 + $0x10] sm:$0xff] (!%p851_p1)  }
  0x79   : > { %907 = vmatpush3.bf16.msra.mxu0 %v1055_v3  ;;  %946 = vmatprep.subr.bf16.mxu1 (!%p851_p1), %v1262_v19  ;;  %v1067_v27 = vld [vmem:[#allocation6 + $0x28] sm:$0xff] (!%p851_p1)   ;;  %v1073_v28 = vld [vmem:[#allocation8 + $0x18] sm:$0xff] (!%p851_p1)   ;;  %v1068_v29 = vld [vmem:[#allocation6 + $0x30] sm:$0xff] (!%p851_p1)  }
  0x7a   : > { %908 = vmatprep.subr.bf16.mxu0 %v1260_v2  ;;  %v852_v31 = vld [vmem:[%s1563_s2] ss:$0 sm:$0xff] (!%p851_p1)  ;;  %v1074_v32 = vld [vmem:[#allocation8 + $0x20] sm:$0xff] (!%p851_p1)   ;;  %v1075_v35 = vld [vmem:[#allocation8 + $0x28] sm:$0xff] (!%p851_p1)  }
  0x7b   : > { %v1069_v34 = vld [vmem:[#allocation6 + $0x38] sm:$0xff] (!%p851_p1)   ;;  %v1076_v37 = vld [vmem:[#allocation8 + $0x30] sm:$0xff] (!%p851_p1)  }
  0x7c   : > { %947 = vmatpush3.bf16.msra.mxu1 (!%p851_p1), %v1071_v24  ;;  %v1077_v38 = vld [vmem:[#allocation8 + $0x38] sm:$0xff] (!%p851_p1)  }
  0x7d   : > { %909 = vmatpush3.bf16.msra.mxu0 %v1056_v4  ;;  %948 = vmatprep.subr.bf16.mxu1 (!%p851_p1), %v1262_v19  ;;  %v853_v39 = vld [vmem:[%s1565_s4] ss:$0 sm:$0xff] (!%p851_p1) }
  0x7e   : > { %910 = vmatprep.subr.bf16.mxu0 %v1260_v2  ;;  %v862_v46 = vld [vmem:[%s1567_s6] ss:$0 sm:$0xff] (!%p851_p1) }
  0x80   : > { %949 = vmatpush3.bf16.msra.mxu1 (!%p851_p1), %v1072_v26 }
  0x81   : > { %911 = vmatpush3.bf16.msra.mxu0 %v1057_v5  ;;  %950 = vmatprep.subr.bf16.mxu1 (!%p851_p1), %v1262_v19 }
  0x82   : > { %912 = vmatprep.subr.bf16.mxu0 %v1260_v2 }
  0x84   : > { %951 = vmatpush3.bf16.msra.mxu1 (!%p851_p1), %v1073_v28 }
  0x85   : > { %913 = vmatpush3.bf16.msra.mxu0 %v1058_v6  ;;  %952 = vmatprep.subr.bf16.mxu1 (!%p851_p1), %v1262_v19 }
  0x86   : > { %914 = vmatprep.subr.bf16.mxu0 %v1260_v2 }
  0x88   : > { %953 = vmatpush3.bf16.msra.mxu1 (!%p851_p1), %v1074_v32 }
  0x89   : > { %915 = vmatpush3.bf16.msra.mxu0 %v1059_v7  ;;  %954 = vmatprep.subr.bf16.mxu1 (!%p851_p1), %v1262_v19 }
  0x8a   : > { %916 = vmatprep.subr.bf16.mxu0 %v1260_v2 }
  0x8c   : > { %955 = vmatpush3.bf16.msra.mxu1 (!%p851_p1), %v1075_v35 }
  0x8d   : > { %917 = vmatpush3.bf16.msra.mxu0 %v1060_v8  ;;  %956 = vmatprep.subr.bf16.mxu1 (!%p851_p1), %v1262_v19 }
  0x8e   : > { %918 = vmatprep.subr.bf16.mxu0 %v1260_v2 }
  0x90   : > { %957 = vmatpush3.bf16.msra.mxu1 (!%p851_p1), %v1076_v37 }
  0x91   : > { %919 = vmatpush3.bf16.msra.mxu0 %v1061_v9  ;;  %958 = vmatprep.subr.bf16.mxu1 (!%p851_p1), %v1262_v19 }
  0x92   : > { %924 = vmatprep.subr.bf16.mxu0 (!%p851_p1), %v1262_v19 }
  0x94   : > { %921 = vmatmul.mubr.bf16.vlgmr.msra.gmra.mrb[0].mxu0 %v371_v11  ;;  %959 = vmatpush3.bf16.msra.mxu1 (!%p851_p1), %v1077_v38 }
  0x95   : > { %925 = vmatpush3.bf16.msra.mxu0 (!%p851_p1), %v1062_v18  ;;  %940 = vmatprep.mubr.msk.bf16.mxu0 (!%p851_p1), %vm1263_vm1, %v1262_v19 }
  0x96   : > { %926 = vmatprep.subr.bf16.mxu0 (!%p851_p1), %v1262_v19 }
  0x99   : > { %927 = vmatpush3.bf16.msra.mxu0 (!%p851_p1), %v1063_v20 }
  0x9a   : > { %928 = vmatprep.subr.bf16.mxu0 (!%p851_p1), %v1262_v19 }
  0x9d   : > { %929 = vmatpush3.bf16.msra.mxu0 (!%p851_p1), %v1064_v21 }
  0x9e   : > { %930 = vmatprep.subr.bf16.mxu0 (!%p851_p1), %v1262_v19 }
  0xa1   : > { %931 = vmatpush3.bf16.msra.mxu0 (!%p851_p1), %v1065_v23 }
  0xa2   : > { %932 = vmatprep.subr.bf16.mxu0 (!%p851_p1), %v1262_v19 }
  0xa5   : > { %933 = vmatpush3.bf16.msra.mxu0 (!%p851_p1), %v1066_v25 }
  0xa6   : > { %934 = vmatprep.subr.bf16.mxu0 (!%p851_p1), %v1262_v19 }
  0xa9   : > { %935 = vmatpush3.bf16.msra.mxu0 (!%p851_p1), %v1067_v27 }
  0xaa   : > { %936 = vmatprep.subr.bf16.mxu0 (!%p851_p1), %v1262_v19 }
  0xad   : > { %937 = vmatpush3.bf16.msra.mxu0 (!%p851_p1), %v1068_v29 }
  0xae   : > { %938 = vmatprep.subr.bf16.mxu0 (!%p851_p1), %v1262_v19 }
  0xb1   : > { %939 = vmatpush3.bf16.msra.mxu0 (!%p851_p1), %v1069_v34 }
 0x164   : > { %481 = sbr.rel (%p851_p1) target bundleno = 831 (0x33f), region = 68 }
 0x167   : > { %v470_v13 = vpop.f32.mrb[0].mxu0 }
 0x168   : > { %v476_v14 = vadd.f32 %v470_v13, %v369_v12  ;;  %v922_v15 = vpop.f32.mrb[1].mxu0 }
 0x169   : > { %v473_v16 = vpop.f32.mrb[2].mxu0 }
 0x16a   : > { %477 = vst [vmem:[#allocation2] sm:$0x3] %v476_v14  ;;  %v923_v17 = vpop.f32.mrb[3].mxu0 }
 0x171   : > { %v482_v30 = vld [vmem:[#allocation2] sm:$0x3] }
 0x172   : > { %v490_v33 = vadd.f32 %v852_v31, %v482_v30 }
 0x174   : > { %v491_v36 = vpack.c.bf16 %v490_v33, %v490_v33 }
 0x176   : > { %941 = vmatmul.mubr.bf16.vlgmr.msra.gmra.mrb[0].mxu0 %v491_v36 }
 0x249   : > { %v597_v40 = vpop.f32.mrb[0].mxu0 }
 0x24a   : > { %v598_v41 = vadd.f32 %v853_v39, %v597_v40  ;;  %v942_v42 = vpop.f32.mrb[1].mxu0 }
 0x24b   : > { %v600_v43 = vpop.f32.mrb[2].mxu0 }
 0x24c   : > { %v603_v44 = vpack.c.bf16 %v598_v41, %v598_v41  ;;  %v943_v45 = vpop.f32.mrb[3].mxu0 }
 0x24e   : > { %961 = vmatmul.mubr.bf16.vlgmr.msra.gmra.mrb[0].mxu1 %v603_v44 }
 0x321   : > { %v709_v47 = vpop.f32.mrb[0].mxu1 }
 0x322   : > { %v710_v48 = vadd.f32 %v862_v46, %v709_v47  ;;  %v962_v49 = vpop.f32.mrb[1].mxu1 }
 0x323   : > { %v712_v50 = vpop.f32.mrb[2].mxu1 }
 0x324   : > { %v871_v51 = vmul.f32 -1.442695, %v710_v48  ;;  %v963_v52 = vpop.f32.mrb[3].mxu1 }
 0x326   : > { %1078 = vpow2.f32 %v871_v51 }
 0x330   : > { %v1079_v53 = vpop.eup %1078 }
 0x331   : > { %v718_v54 = vadd.f32 1.0, %v1079_v53 }
 0x333   : > { %1080 = vrcp.f32 %v718_v54 }
 0x33d   : > { %v1081_v55 = vpop.eup %1080 }
 0x33e   : > { %721 = vst [vmem:[#allocation9] sm:$0x3] %v1081_v55 }
 0x33f PF: > { %s1582_s21 = sadd.s32 4294967295, %s1252_s29   ;;  %s1264_s23 = smov [#allocation9]  }
 0x340   : > { %p1517_p4 = scmp.eq.s32.totalorder %s1582_s21, 1  ;;  %s731_s15 = sshll.u32 %s1264_s23, 4  ;;  %s732_s15 = int_to_ptr.vmem [resolvable:$true] %s731_s15 }
 0x341   : > { %s1168_s14 = scalar_lea.vmem %s732_s15, 32  ;;  %p1175_p11 = scmp.lt.s32.totalorder %s732_s15, %s732_s15 }
 0x342   : > { %p1169_p5 = scmp.ne.s32.totalorder %s732_s15, %s1168_s14  ;;  %p1176_p13 = scmp.lt.s32.totalorder %s1168_s14, %s1168_s14 }
 0x344   : > { %p1170_p8 = pnand %p1169_p5, %p1517_p4  ;;  %p1177_p2 = por %p1176_p13, %p1175_p11 }
 0x346   : > { %p1171_p10 = pneg %p1170_p8 }
 0x348   : > { %p1178_p3 = pnand %p1177_p2, %p1171_p10 }
 0x34a   : > { %1181 = shalt.err (!%p1178_p3)
}
 0x34b   : > { %s1182_s24 = scalar_lea.hbm %s1568_s7, 32 }
 0x34c   : > { %p1183_p12 = scmp.ne.s32.totalorder %s1568_s7, %s1182_s24  ;;  %p1188_p7 = scmp.lt.u32.totalorder %s1182_s24, %s1568_s7 }
 0x34e   : > { %p1184_p0 = pnand %p1183_p12, %p1517_p4 }
 0x350   : > { %p1185_p6 = pneg %p1184_p0 }
 0x352   : > { %p1190_p9 = pnand %p1188_p7, %p1185_p6 }
 0x354   : > { %1193 = shalt.err (!%p1190_p9)
}
 0x355   : > { %975 = dma.vmem_to_hbm [thread:$0]  (%p1517_p4), %s732_s15, 32, %s1568_s7, [#allocation5]  }
 0x356   : > { %1227 = dma.done.wait (%p1517_p4), [#allocation5], 32  }
 0x357   : > { %1229 = vsyncadd (%p1517_p4), [#allocation5], 4294967264 }
 0x358 PF: > { %s22_s29 = sadd.s32 1, %s1252_s29   ;;  %s1584_s24 = smov %s1236_s25 }
 0x359   : > { %p19_p1 = scmp.ge.s32.totalorder %s22_s29, 4   ;;  %s1585_s25 = smov %s1240_s26 }
 0x35a   : > { %s1586_s26 = smov %s1429_s22  ;;  %s1587_s27 = smov %s1248_s28 }
 0x35b   : > { %s1588_s28 = smov %s1590_s17  ;;  %21 = sbr.rel (!%p19_p1) target bundleno = 6 (0x6), region = 105 }
 0x362   :  { %744 = vsyncpa [#allocation4], 1 }
 0x363   :  { %746 = vsyncpa [#allocation4 + $0x1], 1 }
 0x364   :  { %747 = vsyncpa [#allocation7], 1 }
 0x365   :  { %748 = vsyncpa [#allocation5], 1 }
 0x366   :  { %750 = vsyncpa [#allocation5 + $0x1], 1 }

</bundles_post_ra>
